<compile_context>
chip_gen: v7x
topology: tpu7x:2x2x1
jax: 0.10.0
libtpu: 0.0.40
codegen_flags: <defaults>
</compile_context>

<pallas_src>
import math
from functools import partial

import jax
import jax.numpy as jnp
import numpy as np
from jax import lax
from jax.experimental import pallas as pl
from jax.experimental.pallas import tpu as pltpu


# ----------------------------- Pallas kernel -------------------------------

def _self_attention_kernel(x_ref, wq_ref, bq_ref, wk_ref, bk_ref,
                           wv_ref, bv_ref, wp_ref, bp_ref, bias_ref,
                           o_ref, *, num_heads: int):
    # x_ref block: (1, T, C) bf16 -- one batch element per grid step.
    x = x_ref[0]                       # (T, C) bf16
    T, C = x.shape
    hd = C // num_heads
    scale = 1.0 / math.sqrt(hd)

    # QKV projections: bf16 operands on the MXU, f32 accumulation.
    q = jnp.dot(x, wq_ref[...], preferred_element_type=jnp.float32) + bq_ref[0]
    k = jnp.dot(x, wk_ref[...], preferred_element_type=jnp.float32) + bk_ref[0]
    v = jnp.dot(x, wv_ref[...], preferred_element_type=jnp.float32) + bv_ref[0]

    qb = q.astype(jnp.bfloat16)
    kb = k.astype(jnp.bfloat16)
    vb = v.astype(jnp.bfloat16)

    bias = bias_ref[...]               # (T, T) f32 additive mask: 0 or -1e30
    wp = wp_ref[...]                   # (C, C) bf16, Wp^T

    # Contract last dims of q_h and k_h directly (no transpose).
    dn = (((1,), (1,)), ((), ()))

    acc = jnp.zeros((T, C), jnp.float32)
    for h in range(num_heads):         # static unrolled loop over heads
        lo = h * hd
        qh = qb[:, lo:lo + hd]         # (T, hd)
        kh = kb[:, lo:lo + hd]
        vh = vb[:, lo:lo + hd]

        s = lax.dot_general(qh, kh, dn, preferred_element_type=jnp.float32)
        s = s * scale + bias           # masked scores, f32

        m = jnp.max(s, axis=-1, keepdims=True)
        p = jnp.exp(s - m)
        denom = jnp.sum(p, axis=-1, keepdims=True)
        att = p * pl.reciprocal(denom, approx=True)          # softmax (EUP rcp)

        yh = jnp.dot(att.astype(jnp.bfloat16), vh,
                     preferred_element_type=jnp.float32)      # (T, hd)

        # Fold this head straight into the output projection: no lane concat.
        acc = acc + jnp.dot(yh.astype(jnp.bfloat16), wp[lo:lo + hd, :],
                            preferred_element_type=jnp.float32)

    out = acc + bp_ref[0]
    o_ref[0] = out.astype(o_ref.dtype)


# ------------------------------- Wrapper ------------------------------------

def self_attention_pallas(x, params, mask, num_heads):
    """x: (B, T, C) float32. params: torch-style Linear weights (out, in).
    mask: (T, T) float32, 1.0 where attention is allowed."""
    B, T, C = x.shape
    out_dtype = x.dtype

    # torch nn.Linear computes x @ W.T + b; pre-transpose and cast to bf16.
    wq = params["wq"].T.astype(jnp.bfloat16)
    wk = params["wk"].T.astype(jnp.bfloat16)
    wv = params["wv"].T.astype(jnp.bfloat16)
    wp = params["wp"].T.astype(jnp.bfloat16)
    bq = params["bq"].reshape(1, C).astype(jnp.float32)
    bk = params["bk"].reshape(1, C).astype(jnp.float32)
    bv = params["bv"].reshape(1, C).astype(jnp.float32)
    bp = params["bp"].reshape(1, C).astype(jnp.float32)

    # Additive mask bias precomputed once (finite large negative, not -inf).
    mask_bias = jnp.where(mask == 0, jnp.float32(-1e30), jnp.float32(0.0))

    xb = x.astype(jnp.bfloat16)

    full2d = lambda b: (0, 0)          # replicated (un-tiled) operands
    per_batch = lambda b: (b, 0, 0)

    kernel = partial(_self_attention_kernel, num_heads=num_heads)

    return pl.pallas_call(
        kernel,
        out_shape=jax.ShapeDtypeStruct((B, T, C), out_dtype),
        grid_spec=pltpu.PrefetchScalarGridSpec(
            num_scalar_prefetch=0,
            grid=(B,),
            in_specs=[
                pl.BlockSpec((1, T, C), per_batch),   # x (bf16)
                pl.BlockSpec((C, C), full2d),         # Wq^T (bf16)
                pl.BlockSpec((1, C), full2d),         # bq (f32)
                pl.BlockSpec((C, C), full2d),         # Wk^T (bf16)
                pl.BlockSpec((1, C), full2d),         # bk (f32)
                pl.BlockSpec((C, C), full2d),         # Wv^T (bf16)
                pl.BlockSpec((1, C), full2d),         # bv (f32)
                pl.BlockSpec((C, C), full2d),         # Wp^T (bf16)
                pl.BlockSpec((1, C), full2d),         # bp (f32)
                pl.BlockSpec((T, T), full2d),         # additive mask bias (f32)
            ],
            out_specs=pl.BlockSpec((1, T, C), per_batch),
        ),
        compiler_params=pltpu.CompilerParams(
            dimension_semantics=("parallel",)),       # even grid -> v7x megacore
    )(xb, wq, bq, wk, bk, wv, bv, wp, bp, mask_bias)


# ---------------------------- Reference (pure JAX) ---------------------------

def self_attention_ref(x, params, mask, num_heads):
    B, T, C = x.shape
    hd = C // num_heads

    def lin(x, w, b):
        return x @ w.T + b

    q = lin(x, params["wq"], params["bq"]).reshape(B, T, num_heads, hd).transpose(0, 2, 1, 3)
    k = lin(x, params["wk"], params["bk"]).reshape(B, T, num_heads, hd).transpose(0, 2, 1, 3)
    v = lin(x, params["wv"], params["bv"]).reshape(B, T, num_heads, hd).transpose(0, 2, 1, 3)

    att = q @ k.transpose(0, 1, 3, 2) * (1.0 / math.sqrt(hd))
    att = jnp.where(mask[None, None, :, :] == 0, -jnp.inf, att)
    att = jax.nn.softmax(att, axis=-1)
    y = att @ v                                   # (B, H, T, hd)
    y = y.transpose(0, 2, 1, 3).reshape(B, T, C)  # 'b h t e -> b t (h e)'
    return lin(y, params["wp"], params["bp"])


# --------------------------------- Main --------------------------------------

def build_mask(tokens_per_block, max_blocks, attention):
    max_tokens = tokens_per_block * max_blocks
    causal = jnp.tril(jnp.ones((max_tokens, max_tokens), jnp.float32))
    if attention == "causal":
        return causal
    blocks = jax.scipy.linalg.block_diag(
        *[jnp.ones((tokens_per_block, tokens_per_block), jnp.float32)
          for _ in range(max_blocks)])
    return jnp.maximum(causal, blocks)


if __name__ == "__main__":
    # Small config: embed_dim=32, num_heads=4, T = max_tokens = 8.
    tokens_per_block, max_blocks = 4, 2
    attention = "causal"
    num_heads = 4
    embed_dim = 32
    B = 2
    T = tokens_per_block * max_blocks   # 8

    key = jax.random.PRNGKey(0)
    ks = jax.random.split(key, 9)
    bound = 1.0 / math.sqrt(embed_dim)  # torch nn.Linear default init bound
    params = {
        "wq": jax.random.uniform(ks[0], (embed_dim, embed_dim), jnp.float32, -bound, bound),
        "bq": jax.random.uniform(ks[1], (embed_dim,), jnp.float32, -bound, bound),
        "wk": jax.random.uniform(ks[2], (embed_dim, embed_dim), jnp.float32, -bound, bound),
        "bk": jax.random.uniform(ks[3], (embed_dim,), jnp.float32, -bound, bound),
        "wv": jax.random.uniform(ks[4], (embed_dim, embed_dim), jnp.float32, -bound, bound),
        "bv": jax.random.uniform(ks[5], (embed_dim,), jnp.float32, -bound, bound),
        "wp": jax.random.uniform(ks[6], (embed_dim, embed_dim), jnp.float32, -bound, bound),
        "bp": jax.random.uniform(ks[7], (embed_dim,), jnp.float32, -bound, bound),
    }
    x = jax.random.normal(ks[8], (B, T, embed_dim), jnp.float32)

    # mask[L:L+T, :L+T] with L=0 (no kv cache) -> mask[:T, :T]
    mask = build_mask(tokens_per_block, max_blocks, attention)[:T, :T]

    out = self_attention_pallas(x, params, mask, num_heads)
    out = jax.block_until_ready(out)

    ref = self_attention_ref(x, params, mask, num_heads)
    # bf16 MXU inputs with f32 accumulation -> compare at bf16-level tolerance.
    np.testing.assert_allclose(np.asarray(out), np.asarray(ref),
                               rtol=2e-2, atol=2e-2)
    print("KERNEL_OK")
</pallas_src>

<mosaic_0001>
module attributes {stable_mosaic.version = 11 : i64} {
  func.func @_self_attention_kernel(%arg0: i32, %arg1: memref<1x8x32xbf16, #tpu.memory_space<vmem>>, %arg2: memref<32x32xbf16, #tpu.memory_space<vmem>>, %arg3: memref<1x32xf32, #tpu.memory_space<vmem>>, %arg4: memref<32x32xbf16, #tpu.memory_space<vmem>>, %arg5: memref<1x32xf32, #tpu.memory_space<vmem>>, %arg6: memref<32x32xbf16, #tpu.memory_space<vmem>>, %arg7: memref<1x32xf32, #tpu.memory_space<vmem>>, %arg8: memref<32x32xbf16, #tpu.memory_space<vmem>>, %arg9: memref<1x32xf32, #tpu.memory_space<vmem>>, %arg10: memref<8x8xf32, #tpu.memory_space<vmem>>, %arg11: memref<1x8x32xf32, #tpu.memory_space<vmem>>) attributes {dimension_semantics = [#tpu.dimension_semantics<parallel>], iteration_bounds = array<i64: 2>, scalar_prefetch = 0 : i64, scratch_operands = 0 : i64, tpu.core_type = #tpu.core_type<tc>, window_params = [{transform_indices = @transform_0, window_bounds = array<i64: 1, 8, 32>}, {pipeline_mode = #tpu.pipeline_mode<synchronous>, transform_indices = @transform_1, window_bounds = array<i64: 32, 32>}, {pipeline_mode = #tpu.pipeline_mode<synchronous>, transform_indices = @transform_2, window_bounds = array<i64: 1, 32>}, {pipeline_mode = #tpu.pipeline_mode<synchronous>, transform_indices = @transform_3, window_bounds = array<i64: 32, 32>}, {pipeline_mode = #tpu.pipeline_mode<synchronous>, transform_indices = @transform_4, window_bounds = array<i64: 1, 32>}, {pipeline_mode = #tpu.pipeline_mode<synchronous>, transform_indices = @transform_5, window_bounds = array<i64: 32, 32>}, {pipeline_mode = #tpu.pipeline_mode<synchronous>, transform_indices = @transform_6, window_bounds = array<i64: 1, 32>}, {pipeline_mode = #tpu.pipeline_mode<synchronous>, transform_indices = @transform_7, window_bounds = array<i64: 32, 32>}, {pipeline_mode = #tpu.pipeline_mode<synchronous>, transform_indices = @transform_8, window_bounds = array<i64: 1, 32>}, {pipeline_mode = #tpu.pipeline_mode<synchronous>, transform_indices = @transform_9, window_bounds = array<i64: 8, 8>}, {transform_indices = @transform_10, window_bounds = array<i64: 1, 8, 32>}]} {
    %c0 = arith.constant 0 : index
    %c0_0 = arith.constant 0 : index
    %c0_1 = arith.constant 0 : index
    %0 = vector.load %arg1[%c0, %c0_0, %c0_1] : memref<1x8x32xbf16, #tpu.memory_space<vmem>>, vector<1x8x32xbf16>
    %1 = vector.shape_cast %0 : vector<1x8x32xbf16> to vector<8x32xbf16>
    %c0_2 = arith.constant 0 : index
    %c0_3 = arith.constant 0 : index
    %2 = vector.load %arg2[%c0_2, %c0_3] : memref<32x32xbf16, #tpu.memory_space<vmem>>, vector<32x32xbf16>
    %cst = arith.constant dense<0.000000e+00> : vector<8x32xf32>
    %3 = tpu.matmul %1, %2, %cst {dimension_numbers = #tpu.dot_dimension_numbers<[1], [0], [0], [1], [0, 0, 1, 1], [], []>} : vector<8x32xbf16>, vector<32x32xbf16>, vector<8x32xf32> -> vector<8x32xf32>
    %c0_4 = arith.constant 0 : index
    %c0_5 = arith.constant 0 : index
    %4 = vector.load %arg3[%c0_4, %c0_5] : memref<1x32xf32, #tpu.memory_space<vmem>>, vector<1x32xf32>
    %5 = vector.shape_cast %4 : vector<1x32xf32> to vector<32xf32>
    %6 = vector.shape_cast %5 : vector<32xf32> to vector<1x32xf32>
    %7 = vector.broadcast %6 : vector<1x32xf32> to vector<8x32xf32>
    %8 = arith.addf %3, %7 : vector<8x32xf32>
    %c0_6 = arith.constant 0 : index
    %c0_7 = arith.constant 0 : index
    %9 = vector.load %arg4[%c0_6, %c0_7] : memref<32x32xbf16, #tpu.memory_space<vmem>>, vector<32x32xbf16>
    %cst_8 = arith.constant dense<0.000000e+00> : vector<8x32xf32>
    %10 = tpu.matmul %1, %9, %cst_8 {dimension_numbers = #tpu.dot_dimension_numbers<[1], [0], [0], [1], [0, 0, 1, 1], [], []>} : vector<8x32xbf16>, vector<32x32xbf16>, vector<8x32xf32> -> vector<8x32xf32>
    %c0_9 = arith.constant 0 : index
    %c0_10 = arith.constant 0 : index
    %11 = vector.load %arg5[%c0_9, %c0_10] : memref<1x32xf32, #tpu.memory_space<vmem>>, vector<1x32xf32>
    %12 = vector.shape_cast %11 : vector<1x32xf32> to vector<32xf32>
    %13 = vector.shape_cast %12 : vector<32xf32> to vector<1x32xf32>
    %14 = vector.broadcast %13 : vector<1x32xf32> to vector<8x32xf32>
    %15 = arith.addf %10, %14 : vector<8x32xf32>
    %c0_11 = arith.constant 0 : index
    %c0_12 = arith.constant 0 : index
    %16 = vector.load %arg6[%c0_11, %c0_12] : memref<32x32xbf16, #tpu.memory_space<vmem>>, vector<32x32xbf16>
    %cst_13 = arith.constant dense<0.000000e+00> : vector<8x32xf32>
    %17 = tpu.matmul %1, %16, %cst_13 {dimension_numbers = #tpu.dot_dimension_numbers<[1], [0], [0], [1], [0, 0, 1, 1], [], []>} : vector<8x32xbf16>, vector<32x32xbf16>, vector<8x32xf32> -> vector<8x32xf32>
    %c0_14 = arith.constant 0 : index
    %c0_15 = arith.constant 0 : index
    %18 = vector.load %arg7[%c0_14, %c0_15] : memref<1x32xf32, #tpu.memory_space<vmem>>, vector<1x32xf32>
    %19 = vector.shape_cast %18 : vector<1x32xf32> to vector<32xf32>
    %20 = vector.shape_cast %19 : vector<32xf32> to vector<1x32xf32>
    %21 = vector.broadcast %20 : vector<1x32xf32> to vector<8x32xf32>
    %22 = arith.addf %17, %21 : vector<8x32xf32>
    %23 = arith.truncf %8 : vector<8x32xf32> to vector<8x32xbf16>
    %24 = arith.truncf %15 : vector<8x32xf32> to vector<8x32xbf16>
    %25 = arith.truncf %22 : vector<8x32xf32> to vector<8x32xbf16>
    %c0_16 = arith.constant 0 : index
    %c0_17 = arith.constant 0 : index
    %26 = vector.load %arg10[%c0_16, %c0_17] : memref<8x8xf32, #tpu.memory_space<vmem>>, vector<8x8xf32>
    %c0_18 = arith.constant 0 : index
    %c0_19 = arith.constant 0 : index
    %27 = vector.load %arg8[%c0_18, %c0_19] : memref<32x32xbf16, #tpu.memory_space<vmem>>, vector<32x32xbf16>
    %cst_20 = arith.constant 0.000000e+00 : f32
    %28 = vector.broadcast %cst_20 : f32 to vector<8x32xf32>
    %29 = vector.extract_strided_slice %23 {offsets = [0, 0], sizes = [8, 8], strides = [1, 1]} : vector<8x32xbf16> to vector<8x8xbf16>
    %30 = vector.extract_strided_slice %24 {offsets = [0, 0], sizes = [8, 8], strides = [1, 1]} : vector<8x32xbf16> to vector<8x8xbf16>
    %31 = vector.extract_strided_slice %25 {offsets = [0, 0], sizes = [8, 8], strides = [1, 1]} : vector<8x32xbf16> to vector<8x8xbf16>
    %cst_21 = arith.constant dense<0.000000e+00> : vector<8x8xf32>
    %32 = tpu.matmul %29, %30, %cst_21 {dimension_numbers = #tpu.dot_dimension_numbers<[1], [1], [0], [0], [0, 0, 1, 0], [], []>} : vector<8x8xbf16>, vector<8x8xbf16>, vector<8x8xf32> -> vector<8x8xf32>
    %cst_22 = arith.constant 0.353553385 : f32
    %33 = vector.broadcast %cst_22 : f32 to vector<8x8xf32>
    %34 = arith.mulf %32, %33 : vector<8x8xf32>
    %35 = arith.addf %34, %26 : vector<8x8xf32>
    %cst_23 = arith.constant dense<0xFF800000> : vector<8xf32>
    %36 = vector.multi_reduction <maximumf>, %35, %cst_23 [1] : vector<8x8xf32> to vector<8xf32>
    %37 = vector.shape_cast %36 : vector<8xf32> to vector<8x1xf32>
    %38 = vector.broadcast %37 : vector<8x1xf32> to vector<8x8xf32>
    %39 = arith.subf %35, %38 : vector<8x8xf32>
    %40 = math.exp %39 : vector<8x8xf32>
    %cst_24 = arith.constant dense<0.000000e+00> : vector<8xf32>
    %41 = vector.multi_reduction <add>, %40, %cst_24 [1] : vector<8x8xf32> to vector<8xf32>
    %42 = vector.shape_cast %41 : vector<8xf32> to vector<8x1xf32>
    %43 = tpu.reciprocal %42 {approx = true} : vector<8x1xf32> -> vector<8x1xf32>
    %44 = vector.broadcast %43 : vector<8x1xf32> to vector<8x8xf32>
    %45 = arith.mulf %40, %44 : vector<8x8xf32>
    %46 = arith.truncf %45 : vector<8x8xf32> to vector<8x8xbf16>
    %cst_25 = arith.constant dense<0.000000e+00> : vector<8x8xf32>
    %47 = tpu.matmul %46, %31, %cst_25 {dimension_numbers = #tpu.dot_dimension_numbers<[1], [0], [0], [1], [0, 0, 1, 1], [], []>} : vector<8x8xbf16>, vector<8x8xbf16>, vector<8x8xf32> -> vector<8x8xf32>
    %48 = arith.truncf %47 : vector<8x8xf32> to vector<8x8xbf16>
    %49 = vector.extract_strided_slice %27 {offsets = [0, 0], sizes = [8, 32], strides = [1, 1]} : vector<32x32xbf16> to vector<8x32xbf16>
    %cst_26 = arith.constant dense<0.000000e+00> : vector<8x32xf32>
    %50 = tpu.matmul %48, %49, %cst_26 {dimension_numbers = #tpu.dot_dimension_numbers<[1], [0], [0], [1], [0, 0, 1, 1], [], []>} : vector<8x8xbf16>, vector<8x32xbf16>, vector<8x32xf32> -> vector<8x32xf32>
    %51 = arith.addf %28, %50 : vector<8x32xf32>
    %52 = vector.extract_strided_slice %23 {offsets = [0, 8], sizes = [8, 8], strides = [1, 1]} : vector<8x32xbf16> to vector<8x8xbf16>
    %53 = vector.extract_strided_slice %24 {offsets = [0, 8], sizes = [8, 8], strides = [1, 1]} : vector<8x32xbf16> to vector<8x8xbf16>
    %54 = vector.extract_strided_slice %25 {offsets = [0, 8], sizes = [8, 8], strides = [1, 1]} : vector<8x32xbf16> to vector<8x8xbf16>
    %cst_27 = arith.constant dense<0.000000e+00> : vector<8x8xf32>
    %55 = tpu.matmul %52, %53, %cst_27 {dimension_numbers = #tpu.dot_dimension_numbers<[1], [1], [0], [0], [0, 0, 1, 0], [], []>} : vector<8x8xbf16>, vector<8x8xbf16>, vector<8x8xf32> -> vector<8x8xf32>
    %cst_28 = arith.constant 0.353553385 : f32
    %56 = vector.broadcast %cst_28 : f32 to vector<8x8xf32>
    %57 = arith.mulf %55, %56 : vector<8x8xf32>
    %58 = arith.addf %57, %26 : vector<8x8xf32>
    %cst_29 = arith.constant dense<0xFF800000> : vector<8xf32>
    %59 = vector.multi_reduction <maximumf>, %58, %cst_29 [1] : vector<8x8xf32> to vector<8xf32>
    %60 = vector.shape_cast %59 : vector<8xf32> to vector<8x1xf32>
    %61 = vector.broadcast %60 : vector<8x1xf32> to vector<8x8xf32>
    %62 = arith.subf %58, %61 : vector<8x8xf32>
    %63 = math.exp %62 : vector<8x8xf32>
    %cst_30 = arith.constant dense<0.000000e+00> : vector<8xf32>
    %64 = vector.multi_reduction <add>, %63, %cst_30 [1] : vector<8x8xf32> to vector<8xf32>
    %65 = vector.shape_cast %64 : vector<8xf32> to vector<8x1xf32>
    %66 = tpu.reciprocal %65 {approx = true} : vector<8x1xf32> -> vector<8x1xf32>
    %67 = vector.broadcast %66 : vector<8x1xf32> to vector<8x8xf32>
    %68 = arith.mulf %63, %67 : vector<8x8xf32>
    %69 = arith.truncf %68 : vector<8x8xf32> to vector<8x8xbf16>
    %cst_31 = arith.constant dense<0.000000e+00> : vector<8x8xf32>
    %70 = tpu.matmul %69, %54, %cst_31 {dimension_numbers = #tpu.dot_dimension_numbers<[1], [0], [0], [1], [0, 0, 1, 1], [], []>} : vector<8x8xbf16>, vector<8x8xbf16>, vector<8x8xf32> -> vector<8x8xf32>
    %71 = arith.truncf %70 : vector<8x8xf32> to vector<8x8xbf16>
    %72 = vector.extract_strided_slice %27 {offsets = [8, 0], sizes = [8, 32], strides = [1, 1]} : vector<32x32xbf16> to vector<8x32xbf16>
    %cst_32 = arith.constant dense<0.000000e+00> : vector<8x32xf32>
    %73 = tpu.matmul %71, %72, %cst_32 {dimension_numbers = #tpu.dot_dimension_numbers<[1], [0], [0], [1], [0, 0, 1, 1], [], []>} : vector<8x8xbf16>, vector<8x32xbf16>, vector<8x32xf32> -> vector<8x32xf32>
    %74 = arith.addf %51, %73 : vector<8x32xf32>
    %75 = vector.extract_strided_slice %23 {offsets = [0, 16], sizes = [8, 8], strides = [1, 1]} : vector<8x32xbf16> to vector<8x8xbf16>
    %76 = vector.extract_strided_slice %24 {offsets = [0, 16], sizes = [8, 8], strides = [1, 1]} : vector<8x32xbf16> to vector<8x8xbf16>
    %77 = vector.extract_strided_slice %25 {offsets = [0, 16], sizes = [8, 8], strides = [1, 1]} : vector<8x32xbf16> to vector<8x8xbf16>
    %cst_33 = arith.constant dense<0.000000e+00> : vector<8x8xf32>
    %78 = tpu.matmul %75, %76, %cst_33 {dimension_numbers = #tpu.dot_dimension_numbers<[1], [1], [0], [0], [0, 0, 1, 0], [], []>} : vector<8x8xbf16>, vector<8x8xbf16>, vector<8x8xf32> -> vector<8x8xf32>
    %cst_34 = arith.constant 0.353553385 : f32
    %79 = vector.broadcast %cst_34 : f32 to vector<8x8xf32>
    %80 = arith.mulf %78, %79 : vector<8x8xf32>
    %81 = arith.addf %80, %26 : vector<8x8xf32>
    %cst_35 = arith.constant dense<0xFF800000> : vector<8xf32>
    %82 = vector.multi_reduction <maximumf>, %81, %cst_35 [1] : vector<8x8xf32> to vector<8xf32>
    %83 = vector.shape_cast %82 : vector<8xf32> to vector<8x1xf32>
    %84 = vector.broadcast %83 : vector<8x1xf32> to vector<8x8xf32>
    %85 = arith.subf %81, %84 : vector<8x8xf32>
    %86 = math.exp %85 : vector<8x8xf32>
    %cst_36 = arith.constant dense<0.000000e+00> : vector<8xf32>
    %87 = vector.multi_reduction <add>, %86, %cst_36 [1] : vector<8x8xf32> to vector<8xf32>
    %88 = vector.shape_cast %87 : vector<8xf32> to vector<8x1xf32>
    %89 = tpu.reciprocal %88 {approx = true} : vector<8x1xf32> -> vector<8x1xf32>
    %90 = vector.broadcast %89 : vector<8x1xf32> to vector<8x8xf32>
    %91 = arith.mulf %86, %90 : vector<8x8xf32>
    %92 = arith.truncf %91 : vector<8x8xf32> to vector<8x8xbf16>
    %cst_37 = arith.constant dense<0.000000e+00> : vector<8x8xf32>
    %93 = tpu.matmul %92, %77, %cst_37 {dimension_numbers = #tpu.dot_dimension_numbers<[1], [0], [0], [1], [0, 0, 1, 1], [], []>} : vector<8x8xbf16>, vector<8x8xbf16>, vector<8x8xf32> -> vector<8x8xf32>
    %94 = arith.truncf %93 : vector<8x8xf32> to vector<8x8xbf16>
    %95 = vector.extract_strided_slice %27 {offsets = [16, 0], sizes = [8, 32], strides = [1, 1]} : vector<32x32xbf16> to vector<8x32xbf16>
    %cst_38 = arith.constant dense<0.000000e+00> : vector<8x32xf32>
    %96 = tpu.matmul %94, %95, %cst_38 {dimension_numbers = #tpu.dot_dimension_numbers<[1], [0], [0], [1], [0, 0, 1, 1], [], []>} : vector<8x8xbf16>, vector<8x32xbf16>, vector<8x32xf32> -> vector<8x32xf32>
    %97 = arith.addf %74, %96 : vector<8x32xf32>
    %98 = vector.extract_strided_slice %23 {offsets = [0, 24], sizes = [8, 8], strides = [1, 1]} : vector<8x32xbf16> to vector<8x8xbf16>
    %99 = vector.extract_strided_slice %24 {offsets = [0, 24], sizes = [8, 8], strides = [1, 1]} : vector<8x32xbf16> to vector<8x8xbf16>
    %100 = vector.extract_strided_slice %25 {offsets = [0, 24], sizes = [8, 8], strides = [1, 1]} : vector<8x32xbf16> to vector<8x8xbf16>
    %cst_39 = arith.constant dense<0.000000e+00> : vector<8x8xf32>
    %101 = tpu.matmul %98, %99, %cst_39 {dimension_numbers = #tpu.dot_dimension_numbers<[1], [1], [0], [0], [0, 0, 1, 0], [], []>} : vector<8x8xbf16>, vector<8x8xbf16>, vector<8x8xf32> -> vector<8x8xf32>
    %cst_40 = arith.constant 0.353553385 : f32
    %102 = vector.broadcast %cst_40 : f32 to vector<8x8xf32>
    %103 = arith.mulf %101, %102 : vector<8x8xf32>
    %104 = arith.addf %103, %26 : vector<8x8xf32>
    %cst_41 = arith.constant dense<0xFF800000> : vector<8xf32>
    %105 = vector.multi_reduction <maximumf>, %104, %cst_41 [1] : vector<8x8xf32> to vector<8xf32>
    %106 = vector.shape_cast %105 : vector<8xf32> to vector<8x1xf32>
    %107 = vector.broadcast %106 : vector<8x1xf32> to vector<8x8xf32>
    %108 = arith.subf %104, %107 : vector<8x8xf32>
    %109 = math.exp %108 : vector<8x8xf32>
    %cst_42 = arith.constant dense<0.000000e+00> : vector<8xf32>
    %110 = vector.multi_reduction <add>, %109, %cst_42 [1] : vector<8x8xf32> to vector<8xf32>
    %111 = vector.shape_cast %110 : vector<8xf32> to vector<8x1xf32>
    %112 = tpu.reciprocal %111 {approx = true} : vector<8x1xf32> -> vector<8x1xf32>
    %113 = vector.broadcast %112 : vector<8x1xf32> to vector<8x8xf32>
    %114 = arith.mulf %109, %113 : vector<8x8xf32>
    %115 = arith.truncf %114 : vector<8x8xf32> to vector<8x8xbf16>
    %cst_43 = arith.constant dense<0.000000e+00> : vector<8x8xf32>
    %116 = tpu.matmul %115, %100, %cst_43 {dimension_numbers = #tpu.dot_dimension_numbers<[1], [0], [0], [1], [0, 0, 1, 1], [], []>} : vector<8x8xbf16>, vector<8x8xbf16>, vector<8x8xf32> -> vector<8x8xf32>
    %117 = arith.truncf %116 : vector<8x8xf32> to vector<8x8xbf16>
    %118 = vector.extract_strided_slice %27 {offsets = [24, 0], sizes = [8, 32], strides = [1, 1]} : vector<32x32xbf16> to vector<8x32xbf16>
    %cst_44 = arith.constant dense<0.000000e+00> : vector<8x32xf32>
    %119 = tpu.matmul %117, %118, %cst_44 {dimension_numbers = #tpu.dot_dimension_numbers<[1], [0], [0], [1], [0, 0, 1, 1], [], []>} : vector<8x8xbf16>, vector<8x32xbf16>, vector<8x32xf32> -> vector<8x32xf32>
    %120 = arith.addf %97, %119 : vector<8x32xf32>
    %c0_45 = arith.constant 0 : index
    %c0_46 = arith.constant 0 : index
    %121 = vector.load %arg9[%c0_45, %c0_46] : memref<1x32xf32, #tpu.memory_space<vmem>>, vector<1x32xf32>
    %122 = vector.shape_cast %121 : vector<1x32xf32> to vector<32xf32>
    %123 = vector.shape_cast %122 : vector<32xf32> to vector<1x32xf32>
    %124 = vector.broadcast %123 : vector<1x32xf32> to vector<8x32xf32>
    %125 = arith.addf %120, %124 : vector<8x32xf32>
    %c0_47 = arith.constant 0 : index
    %c0_48 = arith.constant 0 : index
    %c0_49 = arith.constant 0 : index
    %126 = vector.load %arg11[%c0_47, %c0_48, %c0_49] : memref<1x8x32xf32, #tpu.memory_space<vmem>>, vector<1x8x32xf32>
    %127 = vector.shape_cast %126 : vector<1x8x32xf32> to vector<8x32xf32>
    %128 = vector.shape_cast %125 : vector<8x32xf32> to vector<1x8x32xf32>
    tpu.vector_store %arg11[%c0_47, %c0_48, %c0_49], %128 {strides = array<i32>} : memref<1x8x32xf32, #tpu.memory_space<vmem>>, vector<1x8x32xf32>,
    return
  }
  func.func @transform_0(%arg0: i32) -> (i32, i32, i32) {
    %c0_i32 = arith.constant 0 : i32
    %c0_i32_0 = arith.constant 0 : i32
    %c0_i32_1 = arith.constant 0 : i32
    return %arg0, %c0_i32, %c0_i32_0 : i32, i32, i32
  }
  func.func @transform_1(%arg0: i32) -> (i32, i32) {
    %c0_i32 = arith.constant 0 : i32
    %c0_i32_0 = arith.constant 0 : i32
    %c0_i32_1 = arith.constant 0 : i32
    return %c0_i32, %c0_i32_0 : i32, i32
  }
  func.func @transform_2(%arg0: i32) -> (i32, i32) {
    %c0_i32 = arith.constant 0 : i32
    %c0_i32_0 = arith.constant 0 : i32
    %c0_i32_1 = arith.constant 0 : i32
    return %c0_i32, %c0_i32_0 : i32, i32
  }
  func.func @transform_3(%arg0: i32) -> (i32, i32) {
    %c0_i32 = arith.constant 0 : i32
    %c0_i32_0 = arith.constant 0 : i32
    %c0_i32_1 = arith.constant 0 : i32
    return %c0_i32, %c0_i32_0 : i32, i32
  }
  func.func @transform_4(%arg0: i32) -> (i32, i32) {
    %c0_i32 = arith.constant 0 : i32
    %c0_i32_0 = arith.constant 0 : i32
    %c0_i32_1 = arith.constant 0 : i32
    return %c0_i32, %c0_i32_0 : i32, i32
  }
  func.func @transform_5(%arg0: i32) -> (i32, i32) {
    %c0_i32 = arith.constant 0 : i32
    %c0_i32_0 = arith.constant 0 : i32
    %c0_i32_1 = arith.constant 0 : i32
    return %c0_i32, %c0_i32_0 : i32, i32
  }
  func.func @transform_6(%arg0: i32) -> (i32, i32) {
    %c0_i32 = arith.constant 0 : i32
    %c0_i32_0 = arith.constant 0 : i32
    %c0_i32_1 = arith.constant 0 : i32
    return %c0_i32, %c0_i32_0 : i32, i32
  }
  func.func @transform_7(%arg0: i32) -> (i32, i32) {
    %c0_i32 = arith.constant 0 : i32
    %c0_i32_0 = arith.constant 0 : i32
    %c0_i32_1 = arith.constant 0 : i32
    return %c0_i32, %c0_i32_0 : i32, i32
  }
  func.func @transform_8(%arg0: i32) -> (i32, i32) {
    %c0_i32 = arith.constant 0 : i32
    %c0_i32_0 = arith.constant 0 : i32
    %c0_i32_1 = arith.constant 0 : i32
    return %c0_i32, %c0_i32_0 : i32, i32
  }
  func.func @transform_9(%arg0: i32) -> (i32, i32) {
    %c0_i32 = arith.constant 0 : i32
    %c0_i32_0 = arith.constant 0 : i32
    %c0_i32_1 = arith.constant 0 : i32
    return %c0_i32, %c0_i32_0 : i32, i32
  }
  func.func @transform_10(%arg0: i32) -> (i32, i32, i32) {
    %c0_i32 = arith.constant 0 : i32
    %c0_i32_0 = arith.constant 0 : i32
    %c0_i32_1 = arith.constant 0 : i32
    return %arg0, %c0_i32, %c0_i32_0 : i32, i32, i32
  }
}

</mosaic_0001>

<bundles_post_ra>
// kernel: tpu_custom_call.1
= control target key start
LH: loop header
LB: loop body
LE: loop exit
PB: predicated region body
PF: predicated region fallthrough
CT: control target
= control target key end

     0   :  { %s2404_s0 = inlined_call_operand.hbm [shape: bf16[2,8,32], index: 0, kind: input, shape index: {}]   ;;  %s2405_s1 = inlined_call_operand.hbm [shape: bf16[32,32], index: 1, kind: input, shape index: {}]   ;;  %s2406_s2 = inlined_call_operand.vmem [shape: f32[1,32], index: 2, kind: input, shape index: {}]   ;;  %s2407_s3 = inlined_call_operand.hbm [shape: bf16[32,32], index: 3, kind: input, shape index: {}]   ;;  %s2408_s4 = inlined_call_operand.vmem [shape: f32[1,32], index: 4, kind: input, shape index: {}]   ;;  %s2409_s5 = inlined_call_operand.vmem [shape: bf16[32,32], index: 5, kind: input, shape index: {}]   ;;  %s2410_s6 = inlined_call_operand.hbm [shape: f32[1,32], index: 6, kind: input, shape index: {}]   ;;  %s2411_s7 = inlined_call_operand.hbm [shape: bf16[32,32], index: 7, kind: input, shape index: {}]   ;;  %s2412_s8 = inlined_call_operand.vmem [shape: f32[1,32], index: 8, kind: input, shape index: {}]   ;;  %s2413_s9 = inlined_call_operand.vmem [shape: f32[8,8], index: 9, kind: input, shape index: {}]   ;;  %s2414_s10 = inlined_call_operand.hbm [shape: f32[2,8,32], index: 10, kind: output, shape index: {}]  }
   0x1   :  { %2419 = sst [smem:[#allocation16_spill]] %s2405_s1 }
   0x2   :  { %2420 = sst [smem:[#allocation17_spill]] %s2412_s8 }
   0x3   :  { %2421 = sst [smem:[#allocation18_spill]] %s2414_s10 }
   0x4   :  { %15 = vsyncpa [#allocation3], 0 }
   0x5   :  { %17 = vsyncpa [#allocation3 + $0x1], 0 }
   0x6   :  { %18 = vsyncpa [#allocation6], 0 }
   0x7   :  { %19 = vsyncpa [#allocation9], 0 }
   0x8   :  { %20 = vsyncpa [#allocation4], 0 }
   0x9   :  { %22 = vsyncpa [#allocation4 + $0x1], 0  ;;  %s1978_s13 = smov 0   ;;  %s1980_s14 = smov 0  }
   0xa   :  { %s1982_s15 = smov 0   ;;  %s1984_s16 = smov 0  }
   0xb LB: > { %s1910_s17 = smov [#allocation5]   ;;  %s1999_s19 = sadd.s32 4294967295, %s1908_s16   ;;  %s1908_s16 = sphi %s1984_s16, %s2445_s16   ;;  %s1904_s15 = sphi %s1982_s15, %s2444_s15   ;;  %s1900_s14 = sphi %s1980_s14, %s2443_s14   ;;  %s1896_s13 = sphi %s1978_s13, %s2442_s13  }
   0xc   : > { %s286_s18 = sshll.u32 %s1910_s17, 4  ;;  %p1403_p0 = scmp.ge.s32.totalorder %s1908_s16, 1  ;;  %s2004_s18 = int_to_ptr.vmem [resolvable:$true] %s286_s18 }
   0xd   : > { %p2416_p1 = scmp.eq.s32.totalorder %s1999_s19, 0  ;;  %p274_p2 = scmp.lt.s32.totalorder %s1908_s16, 3 }
   0xe   : > { %s1911_s21 = smov [#allocation8]   ;;  %s1912_s24 = smov [#allocation7]  }
   0xf   : > { %p2006_p3 = pnand %p1403_p0, %p274_p2  ;;  %s322_s22 = sshll.u32 %s1911_s21, 4  ;;  %s2019_s22 = int_to_ptr.vmem [resolvable:$true] %s322_s22 }
  0x10   : > { %s302_s25 = sshll.u32 %s1912_s24, 4  ;;  %s2424_s1 = sld [smem:[#allocation16_spill]]  ;;  %s2021_s25 = int_to_ptr.vmem [resolvable:$true] %s302_s25 }
  0x11   : > { %s2422_s20 = scalar_select %p2006_p3, 1, 0 }
  0x12   : > { %p1596_p5 = pneg %p2006_p3 }
  0x14   : > { %p2015_p6 = pnand %p1596_p5, %p2416_p1 }
  0x16   : > { %s1692_s28 = scalar_lea.hbm %s2424_s1, 256  ;;  %p2031_p8 = pneg %p2015_p6 }
  0x17   : > { %p1693_p7 = scmp.ne.s32.totalorder %s2424_s1, %s1692_s28  ;;  %p1699_p11 = scmp.lt.u32.totalorder %s1692_s28, %s2424_s1 }
  0x19   : > { %p1695_p9 = pnand %p2031_p8, %p1693_p7 }
  0x1b   : > { %p1696_p10 = pneg %p1695_p9 }
  0x1d   : > { %p1701_p12 = pnand %p1699_p11, %p1696_p10 }
  0x1f   : > { %1704 = shalt.err (!%p1701_p12)
}
  0x20   : > { %s1705_s21 = scalar_lea.vmem %s2004_s18, 256  ;;  %p1713_p5 = scmp.lt.s32.totalorder %s2004_s18, %s2004_s18 }
  0x21   : > { %p1706_p13 = scmp.ne.s32.totalorder %s2004_s18, %s1705_s21  ;;  %p1714_p4 = scmp.lt.s32.totalorder %s1705_s21, %s1705_s21 }
  0x23   : > { %p1708_p0 = pnand %p1706_p13, %p2031_p8  ;;  %p1715_p7 = por %p1714_p4, %p1713_p5 }
  0x25   : > { %p1709_p2 = pneg %p1708_p0 }
  0x27   : > { %p1716_p9 = pnand %p1715_p7, %p1709_p2 }
  0x29   : > { %1719 = shalt.err (!%p1716_p9)
}
  0x2a   : > { %s1913_s24 = smov 64   ;;  %s1914_s26 = smov 4  }
  0x2b   : > { %1599 = dma.hbm_to_vmem [thread:$0]  (!%p2015_p6), %s2424_s1, 256, %s2004_s18, [#allocation6], %s1913_s24, %s1913_s24, %s1914_s26  }
  0x2c   : > { %s1720_s12 = scalar_lea.hbm %s2410_s6, 16 }
  0x2d   : > { %p1721_p4 = scmp.ne.s32.totalorder %s2410_s6, %s1720_s12  ;;  %p1727_p12 = scmp.lt.u32.totalorder %s1720_s12, %s2410_s6 }
  0x2f   : > { %p1723_p10 = pnand %p1721_p4, %p2031_p8 }
  0x31   : > { %p1724_p11 = pneg %p1723_p10 }
  0x33   : > { %p1729_p13 = pnand %p1727_p12, %p1724_p11 }
  0x35   : > { %1732 = shalt.err (!%p1729_p13)
}
  0x36   : > { %s1733_s18 = scalar_lea.vmem %s2019_s22, 16  ;;  %s1740_s27 = scalar_lea.vmem %s2019_s22, 32 }
  0x37   : > { %p1734_p0 = scmp.ne.s32.totalorder %s2019_s22, %s1733_s18  ;;  %p1741_p7 = scmp.lt.s32.totalorder %s2019_s22, %s2019_s22 }
  0x38   : > { %p1742_p9 = scmp.lt.s32.totalorder %s1740_s27, %s1733_s18 }
  0x39   : > { %p1736_p2 = pnand %p1734_p0, %p2031_p8 }
  0x3a   : > { %p1743_p4 = por %p1742_p9, %p1741_p7 }
  0x3b   : > { %p1737_p5 = pneg %p1736_p2 }
  0x3d   : > { %p1744_p10 = pnand %p1743_p4, %p1737_p5 }
  0x3f   : > { %1747 = shalt.err (!%p1744_p10)
}
  0x40   : > { %1605 = dma.hbm_to_vmem [thread:$0]  (!%p2015_p6), %s2410_s6, 16, %s2019_s22, [#allocation9]  }
  0x41   : > { %s1748_s30 = scalar_lea.hbm %s2407_s3, 256 }
  0x42   : > { %p1749_p11 = scmp.ne.s32.totalorder %s2407_s3, %s1748_s30  ;;  %p1755_p0 = scmp.lt.u32.totalorder %s1748_s30, %s2407_s3 }
  0x44   : > { %p1751_p12 = pnand %p1749_p11, %p2031_p8 }
  0x46   : > { %p1752_p13 = pneg %p1751_p12 }
  0x48   : > { %p1757_p2 = pnand %p1755_p0, %p1752_p13 }
  0x4a   : > { %1760 = shalt.err (!%p1757_p2)
}
  0x4b   : > { %s1761_s22 = scalar_lea.vmem %s2021_s25, 256  ;;  %p1769_p4 = scmp.lt.s32.totalorder %s2021_s25, %s2021_s25 }
  0x4c   : > { %p1762_p5 = scmp.ne.s32.totalorder %s2021_s25, %s1761_s22  ;;  %p1770_p10 = scmp.lt.s32.totalorder %s1761_s22, %s1761_s22 }
  0x4e   : > { %p1764_p7 = pnand %p1762_p5, %p2031_p8  ;;  %p1771_p11 = por %p1770_p10, %p1769_p4 }
  0x50   : > { %p1765_p9 = pneg %p1764_p7 }
  0x52   : > { %p1772_p12 = pnand %p1771_p11, %p1765_p9 }
  0x54   : > { %1775 = shalt.err (!%p1772_p12)
}
  0x55   : > { %1602 = dma.hbm_to_vmem [thread:$0]  (!%p2015_p6), %s2407_s3, 256, %s2021_s25, [#allocation6], %s1913_s24, %s1913_s24, %s1914_s26  }
  0x56   : > { %s1915_s10 = smov [#allocation10]   ;;  %s1776_s12 = scalar_lea.hbm %s2411_s7, 256 }
  0x57   : > { %s332_s28 = sshll.u32 %s1915_s10, 4  ;;  %p1777_p13 = scmp.ne.s32.totalorder %s2411_s7, %s1776_s12  ;;  %s333_s28 = int_to_ptr.vmem [resolvable:$true] %s332_s28 }
  0x58   : > { %p1783_p5 = scmp.lt.u32.totalorder %s1776_s12, %s2411_s7 }
  0x59   : > { %p1779_p0 = pnand %p1777_p13, %p2031_p8 }
  0x5b   : > { %p1780_p2 = pneg %p1779_p0 }
  0x5d   : > { %p1785_p7 = pnand %p1783_p5, %p1780_p2 }
  0x5f   : > { %1788 = shalt.err (!%p1785_p7)
}
  0x60   : > { %s1789_s25 = scalar_lea.vmem %s333_s28, 256  ;;  %p1797_p11 = scmp.lt.s32.totalorder %s333_s28, %s333_s28 }
  0x61   : > { %p1790_p9 = scmp.ne.s32.totalorder %s333_s28, %s1789_s25  ;;  %p1798_p12 = scmp.lt.s32.totalorder %s1789_s25, %s1789_s25 }
  0x63   : > { %p1792_p4 = pnand %p1790_p9, %p2031_p8  ;;  %p1799_p1 = por %p1798_p12, %p1797_p11 }
  0x65   : > { %p1793_p10 = pneg %p1792_p4 }
  0x67   : > { %p1800_p3 = pnand %p1799_p1, %p1793_p10 }
  0x69   : > { %1803 = shalt.err (!%p1800_p3)
}
  0x6a   : > { %1608 = dma.hbm_to_vmem [thread:$0]  (!%p2015_p6), %s2411_s7, 256, %s333_s28, [#allocation9], %s1913_s24, %s1913_s24, %s1914_s26  }
  0x6b   : > { %s1402_s23 = sadd.s32 4294967294, %s1908_s16   ;;  %s2128_s11 = sadd.s32 1, %s1908_s16  }
  0x6c   : > { %s32_s10 = ssub.s32 %s1908_s16, %s2128_s11  ;;  %s35_s29 = sadd.s32 1, %s1904_s15 }
  0x6d   : > { %p33_p1 = scmp.eq.s32.totalorder %s32_s10, 0  ;;  %p42_p3 = scmp.ne.s32.totalorder %s1904_s15, %s1900_s14 }
  0x6e   : > { %p43_p8 = scmp.eq.s32.totalorder %s1908_s16, 0  ;;  %p48_p13 = scmp.ne.s32.totalorder %s1900_s14, %s1896_s13 }
  0x6f   : > { %s2139_s30 = scalar_select %p33_p1, %s1904_s15, %s35_s29  }
  0x70   : > { %p2141_p0 = por %p43_p8, %p42_p3  ;;  %p2427_p2 = scmp.eq.s32.totalorder %s1999_s19, 0 }
  0x71   : > { %p261_p5 = scmp.eq.s32.totalorder %s1999_s19, 1  ;;  %p267_p7 = scmp.eq.s32.totalorder %s1402_s23, 1 }
  0x72   : > { %p2147_p6 = por %p2427_p2, %p48_p13  ;;  %p1621_p9 = scmp.lt.s32.totalorder %s1908_s16, 2 }
  0x73   : > { %s352_s26 = sand.u32 1, %s1904_s15   ;;  %p2154_p4 = por %p261_p5, %p42_p3 }
  0x74   : > { %p2158_p10 = por %p267_p7, %p48_p13  ;;  %s1409_s21 = sshll.u32 %s352_s26, 2 }
  0x75   : > { %s2429_s28 = scalar_select %p2154_p4, 1, 0 }
  0x76   : > { %s2430_s17 = scalar_select %p2158_p10, 1, 0 }
  0x77   : > { %s1410_s18 = sshll.u32 %s1908_s16, 6  ;;  %s356_s8 = scalar_lea.vmem [#allocation2], %s1409_s21 }
  0x78   : > { %s2166_s27 = scalar_lea.hbm %s2404_s0, %s1410_s18  ;;  %s363_s23 = sshll.u32 %s356_s8, 4  ;;  %s2168_s23 = int_to_ptr.vmem [resolvable:$true] %s363_s23 }
  0x79   : > { %p2172_p11 = pnand %p1621_p9, %p2141_p0  ;;  %s353_s29 = scalar_lea.sflag [#allocation3], %s352_s26 }
  0x7a   : > { %s1804_s1 = scalar_lea.hbm %s2166_s27, 64  ;;  %s1809_s22 = scalar_lea.hbm %s2404_s0, 128 }
  0x7b   : > { %p1805_p12 = scmp.ne.s32.totalorder %s2166_s27, %s1804_s1  ;;  %p1806_p1 = pneg %p2172_p11 }
  0x7c   : > { %p1810_p13 = scmp.lt.u32.totalorder %s2166_s27, %s2404_s0  ;;  %p1811_p0 = scmp.lt.u32.totalorder %s1809_s22, %s1804_s1 }
  0x7d   : > { %p1807_p3 = pnand %p1806_p1, %p1805_p12  ;;  %p1813_p5 = scmp.lt.u32.totalorder %s1804_s1, %s2166_s27 }
  0x7e   : > { %p1812_p2 = por %p1811_p0, %p1810_p13 }
  0x7f   : > { %p1808_p8 = pneg %p1807_p3 }
  0x80   : > { %p1814_p7 = por %p1813_p5, %p1812_p2 }
  0x82   : > { %p1815_p9 = pnand %p1814_p7, %p1808_p8 }
  0x84   : > { %1818 = shalt.err (!%p1815_p9)
}
  0x85   : > { %s1819_s26 = scalar_lea.vmem %s2168_s23, 64  ;;  %s1916_s8 = smov [#allocation2]  }
  0x86   : > { %p1820_p12 = scmp.ne.s32.totalorder %s2168_s23, %s1819_s26  ;;  %s1824_s21 = sshll.u32 %s1916_s8, 4  ;;  %s1825_s21 = int_to_ptr.vmem [resolvable:$false] %s1824_s21 }
  0x87   : > { %s1826_s18 = scalar_lea.vmem %s1825_s21, 128  ;;  %p1827_p4 = scmp.lt.s32.totalorder %s2168_s23, %s1825_s21 }
  0x88   : > { %p1822_p3 = pnand %p1820_p12, %p1806_p1  ;;  %p1828_p13 = scmp.lt.s32.totalorder %s1826_s18, %s1819_s26 }
  0x8a   : > { %p1823_p10 = pneg %p1822_p3  ;;  %p1829_p0 = por %p1828_p13, %p1827_p4 }
  0x8c   : > { %p1830_p2 = pnand %p1829_p0, %p1823_p10 }
  0x8e   : > { %1833 = shalt.err (!%p1830_p2)
}
  0x8f   : > { %1612 = dma.hbm_to_vmem [thread:$0]  (!%p2172_p11), %s2166_s27, 64, %s2168_s23, %s353_s29  }
  0x90   : > { %p2432_p8 = scmp.ne.s32.totalorder %s2422_s20, 0 }
  0x91   : > { %s2204_s1 = sand.u32 (!%p2432_p8), 1, %s1900_s14  }
  0x92   : > { %372 = sbr.rel (%p2432_p8) target bundleno = 2779 (0xadb), region = 60  ;;  %s1412_s22 = sshll.u32 (!%p2432_p8), %s2204_s1, 2 }
  0x93   : > { %s375_s12 = scalar_lea.sflag (!%p2432_p8), [#allocation3], %s2204_s1  ;;  %s378_s25 = scalar_lea.vmem (!%p2432_p8), [#allocation2], %s1412_s22 }
  0x99   : > { %1879 = dma.done.wait (%p2147_p6), %s375_s12, 64  }
  0x9a   : > { %1881 = vsyncadd (%p2147_p6), %s375_s12, 4294967232  ;;  %p2433_p4 = scmp.eq.s32.totalorder %s1999_s19, 0 }
  0x9c   : > { %1883 = dma.done.wait (%p2433_p4), [#allocation6], 512   ;;  %p2434_p10 = pmov %p2433_p4 }
  0x9d   : > { %p2435_p11 = pmov %p2433_p4 }
  0x9e   : > { %1885 = vsyncadd (%p2434_p10), [#allocation6], 4294966784 }
  0x9f   : > { %1887 = dma.done.wait (%p2435_p11), [#allocation9], 272   ;;  %p2436_p1 = pmov %p2433_p4 }
  0xa0   : > { %v1917_v0 = vmov 0.0   ;;  %vm1918_vm0 = vmmov 0   ;;  %v1670_v1 = vld [vmem:[#allocation7] sm:$0xff]   ;;  %v1671_v2 = vld [vmem:[#allocation7 + $0x8] sm:$0xff]   ;;  %v1672_v3 = vld [vmem:[#allocation5] sm:$0xff]   ;;  %vm456_vm1 = vcmask 261120  }
  0xa1   : > { %1889 = vsyncadd (%p2436_p1), [#allocation9], 4294967024  ;;  %1488 = vmatprep.subr.bf16.mxu1 %v1917_v0  ;;  %1480 = vmatprep.subr.bf16.mxu0 %v1917_v0  ;;  %v1673_v4 = vld [vmem:[#allocation5 + $0x8] sm:$0xff]   ;;  %v432_v5 = vld [vmem:[%s378_s25] sm:$0xf]  ;;  %vm634_vm2 = vcmask 64512  }
  0xa2   : > { %1492 = vmatprep.mubr.msk.bf16.mxu1 %vm1918_vm0, %v1917_v0  ;;  %1484 = vmatprep.mubr.msk.bf16.mxu0 %vm1918_vm0, %v1917_v0  ;;  %v1422_v6 = vld [vmem:[%s2408_s4] ss:$0 sm:$0xff]  ;;  %s1919_s10 = smov 120   ;;  %v1675_v22 = vld [vmem:[%s2409_s5 + $0x8] sm:$0xff]   ;;  %v1426_v50 = vld [vmem:[#allocation8] ss:$0 sm:$0xff] }
  0xa3   : > { %1489 = vmatpush3.bf16.msra.mxu1 %v1670_v1  ;;  %1481 = vmatpush3.bf16.msra.mxu0 %v1672_v3  ;;  %v1418_v8 = vld [vmem:[%s2406_s2] ss:$0 sm:$0xff]  ;;  %s1920_s12 = smov 112   ;;  %vm698_vm3 = vcmask 1043456   ;;  %s1921_s25 = smov 104  }
  0xa4   : > { %1490 = vmatprep.subr.bf16.mxu1 %v1917_v0  ;;  %1482 = vmatprep.subr.bf16.mxu0 %v1917_v0  ;;  %v1674_v21 = vld [vmem:[%s2409_s5] sm:$0xff]   ;;  %s1417_s20 = sshll.u32 %s2204_s1, 3  ;;  %s2437_s23 = sld [smem:[#allocation17_spill]] }
  0xa5   : > { %v2276_v27 = vld [vmem:[%s2413_s9] sm:$0xff]  ;;  %s430_s29 = scalar_lea.vmem [#allocation11], %s1417_s20  ;;  %s2438_s18 = sld [smem:[#allocation18_spill]] }
  0xa6   : > { %v631_v63 = vld [vmem:[#allocation10 + $0x4] sm:$0xf]  ;;  %s1294_s26 = sshll.u32 %s430_s29, 4  ;;  %p2439_p5 = scmp.ne.s32.totalorder %s2429_s28, 0  ;;  %s2361_s26 = int_to_ptr.vmem [resolvable:$true] %s1294_s26 }
  0xa7   : > { %1491 = vmatpush3.bf16.msra.mxu1 %v1671_v2  ;;  %1483 = vmatpush3.bf16.msra.mxu0 %v1673_v4  ;;  %v863_v1 = vsel %vm698_vm3, %v631_v63, 0 }
  0xa8   : > { %1504 = vmatprep.subr.bf16.mxu1 %v1917_v0  ;;  %1496 = vmatprep.subr.bf16.mxu0 %v1917_v0 }
  0xaa   : > { %1493 = vmatmul.mubr.msk.bf16.vlgmr.msra.gmra.mrb[0].mxu1 %vm456_vm1, %v432_v5  ;;  %1485 = vmatmul.mubr.msk.bf16.vlgmr.msra.gmra.mrb[0].mxu0 %vm456_vm1, %v432_v5 }
  0xab   : > { %1506 = vmatprep.mubr.msk.bf16.mxu1 %vm1918_vm0, %v1917_v0  ;;  %1500 = vmatprep.mubr.msk.bf16.mxu0 %vm1918_vm0, %v1917_v0 }
  0xac   : > { %1497 = vmatpush3.bf16.msra.mxu0 %v1674_v21 }
  0xad   : > { %1498 = vmatprep.subr.bf16.mxu0 %v1917_v0 }
  0xb0   : > { %1499 = vmatpush3.bf16.msra.mxu0 %v1675_v22 }
  0xb1   : > { %1510 = vmatprep.subr.bf16.mxu0 %v1917_v0 }
  0xb3   : > { %1501 = vmatmul.mubr.msk.bf16.vlgmr.msra.gmra.mrb[4].mxu0 %vm456_vm1, %v432_v5 }
  0xb4   : > { %1512 = vmatprep.mubr.msk.bf16.mxu0 %vm1918_vm0, %v1917_v0 }
 0x17d   : > { %v557_v7 = vpop.f32.mrb[0].mxu1  ;;  %v494_v12 = vpop.f32.mrb[0].mxu0 }
 0x17e   : > { %v558_v9 = vadd.f32 %v1422_v6, %v557_v7  ;;  %v1494_v10 = vpop.f32.mrb[1].mxu1  ;;  %v495_v15 = vadd.f32 %v1418_v8, %v494_v12  ;;  %v1486_v16 = vpop.f32.mrb[1].mxu0  ;;  %v630_v6 = vld [vmem:[#allocation10] sm:$0xf] }
 0x17f   : > { %v560_v11 = vpop.f32.mrb[2].mxu1  ;;  %v497_v17 = vpop.f32.mrb[2].mxu0 }
 0x180   : > { %v2242_v13 = vpack.c.bf16 %v558_v9, %v558_v9  ;;  %v1495_v14 = vpop.f32.mrb[3].mxu1  ;;  %v2246_v18 = vpack.c.bf16 %v495_v15, %v495_v15  ;;  %v1487_v20 = vpop.f32.mrb[3].mxu0  ;;  %v909_v9 = vsel %vm698_vm3, %v630_v6, 0 }
 0x182   : > { %747 = vrot.lane.b32.xlu0 %v2242_v13, %s1919_s10  ;;  %v639_v19 = vsel %vm634_vm2, %v2242_v13, 0 }
 0x183   : > { %1505 = vmatpush3.bf16.xpose.msra.mxu1 %v639_v19 }
 0x184   : > { %1516 = vmatprep.subr.bf16.mxu1 %v1917_v0 }
 0x186   : > { %744 = vrot.lane.b32.xlu0 %v2246_v18, %s1919_s10  ;;  %v620_v44 = vpop.f32.mrb[4].mxu0 }
 0x187   : > { %v1502_v45 = vpop.f32.mrb[5].mxu0  ;;  %v621_v51 = vadd.f32 %v1426_v50, %v620_v44 }
 0x188   : > { %v623_v46 = vpop.f32.mrb[6].mxu0 }
 0x189   : > { %v1503_v47 = vpop.f32.mrb[7].mxu0  ;;  %v2283_v52 = vpack.c.bf16 %v621_v51, %v621_v51 }
 0x18a   : > { %1507 = vmatmul.mubr.msk.bf16.vlgmr.msra.gmra.mrb[4].mxu1 %vm634_vm2, %v2246_v18 }
 0x18b   : > { %1518 = vmatprep.mubr.msk.bf16.mxu1 %vm1918_vm0, %v1917_v0  ;;  %v700_v53 = vsel %vm698_vm3, %v2283_v52, 0 }
 0x18c   : > { %1511 = vmatpush3.bf16.msra.mxu0 %v700_v53 }
 0x18d   : > { %1522 = vmatprep.subr.bf16.mxu0 %v1917_v0 }
 0x1f4   : > { %v748_v23 = vpop.permute.xlu0 %747 }
 0x1f5   : > { %v753_v24 = vsel %vm634_vm2, %v748_v23, 0 }
 0x1f6   : > { %1517 = vmatpush3.bf16.xpose.msra.mxu1 %v753_v24 }
 0x1f7   : > { %1528 = vmatprep.subr.bf16.mxu1 %v1917_v0 }
 0x1f8   : > { %v745_v25 = vpop.permute.xlu0 %744 }
 0x1fd   : > { %1519 = vmatmul.mubr.msk.bf16.vlgmr.msra.gmra.mrb[8].mxu1 %vm634_vm2, %v745_v25 }
 0x1fe   : > { %1530 = vmatprep.mubr.msk.bf16.mxu1 %vm1918_vm0, %v1917_v0  ;;  %1529 = vmatpush3.bf16.msra.mxu1 %v863_v1 }
 0x1ff   : > { %1540 = vmatprep.subr.bf16.mxu1 %v1917_v0 }
 0x25d   : > { %v675_v26 = vpop.f32.mrb[4].mxu1 }
 0x25e   : > { %v681_v28 = vmul.f32 0.35355338, %v675_v26  ;;  %v1508_v29 = vpop.f32.mrb[5].mxu1 }
 0x25f   : > { %v678_v30 = vpop.f32.mrb[6].mxu1 }
 0x260   : > { %v1509_v31 = vpop.f32.mrb[7].mxu1  ;;  %v682_v32 = vadd.f32 %v681_v28, %v2276_v27 }
 0x262   : > { %v683_v33 = vsel %vm634_vm2, %v682_v32, -inf }
 0x263   : > { %684 = vmax.xlane.f32.xlu1 %v683_v33 }
 0x2d0   : > { %v789_v34 = vpop.f32.mrb[8].mxu1 }
 0x2d1   : > { %v795_v35 = vmul.f32 0.35355338, %v789_v34  ;;  %v1520_v36 = vpop.f32.mrb[9].mxu1 }
 0x2d2   : > { %v792_v37 = vpop.f32.mrb[10].mxu1 }
 0x2d3   : > { %v1521_v38 = vpop.f32.mrb[11].mxu1  ;;  %v796_v39 = vadd.f32 %v795_v35, %v2276_v27 }
 0x2d5   : > { %v797_v40 = vsel %vm634_vm2, %v796_v39, -inf }
 0x2d6   : > { %798 = vmax.xlane.f32.xlu1 %v797_v40 }
 0x2f0   : > { %v685_v41 = vpop.xlane.xlu1 %684 }
 0x2f1   : > { %v686_v42 = vsub.f32 %v682_v32, %v685_v41 }
 0x2f3   : > { %v687_v43 = vmul.f32 1.442695, %v686_v42 }
 0x2f5   : > { %1676 = vpow2.f32 %v687_v43 }
 0x2ff   : > { %v1677_v48 = vpop.eup %1676 }
 0x300   : > { %v689_v49 = vsel %vm634_vm2, %v1677_v48, 0.0 }
 0x301   : > { %690 = vadd.xlane.f32.xlu0 %v689_v49 }
 0x317   : > { %1015 = vrot.lane.b32.xlu0 %v2283_v52, %s1920_s12 }
 0x363   : > { %v799_v54 = vpop.xlane.xlu1 %798 }
 0x364   : > { %v800_v55 = vsub.f32 %v796_v39, %v799_v54 }
 0x366   : > { %v801_v56 = vmul.f32 1.442695, %v800_v55 }
 0x368   : > { %1678 = vpow2.f32 %v801_v56 }
 0x372   : > { %v1679_v57 = vpop.eup %1678 }
 0x373   : > { %v803_v58 = vsel %vm634_vm2, %v1679_v57, 0.0 }
 0x374   : > { %804 = vadd.xlane.f32.xlu1 %v803_v58 }
 0x385   : > { %810 = vrot.lane.b32.xlu1 %v2283_v52, %s1919_s10  ;;  %s1444_s10 = sshll.u32 %s1999_s19, 7  ;;  %s1281_s19 = scalar_lea.sflag [#allocation4], %s2204_s1 }
 0x386   : > { %s2359_s22 = scalar_lea.hbm %s2438_s18, %s1444_s10 }
 0x389   : > { %953 = vrot.lane.b32.xlu1 %v2242_v13, %s1920_s12 }
 0x38d   : > { %951 = vrot.lane.b32.xlu1 %v2246_v18, %s1920_s12  ;;  %s1834_s12 = scalar_lea.vmem %s2361_s26, 128 }
 0x38e   : > { %v691_v59 = vpop.xlane.xlu0 %690  ;;  %p1835_p6 = scmp.ne.s32.totalorder %s2361_s26, %s1834_s12 }
 0x38f   : > { %1680 = vrcp.f32 %v691_v59 }
 0x390   : > { %p1836_p7 = pnand %p1835_p6, %p2439_p5 }
 0x392   : > { %v1016_v10 = vpop.permute.xlu0 %1015  ;;  %p1837_p9 = pneg %p1836_p7 }
 0x393   : > { %v1021_v16 = vsel %vm698_vm3, %v1016_v10, 0 }
 0x399   : > { %v1681_v60 = vpop.eup %1680 }
 0x39a   : > { %v693_v61 = vmul.f32 %v1681_v60, %v1677_v48 }
 0x39c   : > { %v694_v62 = vpack.c.bf16 %v693_v61, %v693_v61 }
 0x39e   : > { %1513 = vmatmul.mubr.msk.bf16.vlgmr.msra.gmra.mrb[8].mxu0 %vm634_vm2, %v694_v62 }
 0x39f   : > { %1524 = vmatprep.mubr.msk.bf16.mxu0 %vm1918_vm0, %v1917_v0 }
 0x401   : > { %v805_v2 = vpop.xlane.xlu1 %804 }
 0x402   : > { %1682 = vrcp.f32 %v805_v2 }
 0x405   : > { %v811_v3 = vpop.permute.xlu1 %810 }
 0x406   : > { %v816_v4 = vsel %vm698_vm3, %v811_v3, 0 }
 0x407   : > { %1523 = vmatpush3.bf16.msra.mxu0 %v816_v4 }
 0x408   : > { %1534 = vmatprep.subr.bf16.mxu0 %v1917_v0 }
 0x409   : > { %v954_v19 = vpop.permute.xlu1 %953 }
 0x40a   : > { %v959_v24 = vsel %vm634_vm2, %v954_v19, 0 }
 0x40c   : > { %v1683_v5 = vpop.eup %1682 }
 0x40d   : > { %v807_v7 = vmul.f32 %v1683_v5, %v1679_v57  ;;  %v952_v26 = vpop.permute.xlu1 %951 }
 0x40f   : > { %v808_v8 = vpack.c.bf16 %v807_v7, %v807_v7 }
 0x411   : > { %1525 = vmatmul.mubr.msk.bf16.vlgmr.msra.gmra.mrb[12].mxu0 %vm634_vm2, %v808_v8 }
 0x412   : > { %1535 = vmatpush3.bf16.msra.mxu0 %v909_v9  ;;  %1536 = vmatprep.mubr.msk.bf16.mxu0 %vm1918_vm0, %v1917_v0 }
 0x413   : > { %1546 = vmatprep.subr.bf16.mxu0 %v1917_v0 }
 0x471   : > { %v736_v11 = vpop.f32.mrb[8].mxu0 }
 0x472   : > { %v742_v12 = vpack.c.bf16 %v736_v11, %v736_v11  ;;  %v1514_v14 = vpop.f32.mrb[9].mxu0 }
 0x473   : > { %v739_v15 = vpop.f32.mrb[10].mxu0 }
 0x474   : > { %v1515_v17 = vpop.f32.mrb[11].mxu0  ;;  %1537 = vmatmul.mubr.msk.bf16.vlgmr.msra.gmra.mrb[16].mxu0 %vm634_vm2, %v742_v12 }
 0x475   : > { %1547 = vmatpush3.bf16.msra.mxu0 %v1021_v16  ;;  %1548 = vmatprep.mubr.msk.bf16.mxu0 %vm1918_vm0, %v1917_v0 }
 0x476   : > { %1558 = vmatprep.subr.bf16.mxu0 %v1917_v0 }
 0x4e4   : > { %v852_v20 = vpop.f32.mrb[12].mxu0 }
 0x4e5   : > { %v858_v21 = vpack.c.bf16 %v852_v20, %v852_v20  ;;  %v1526_v22 = vpop.f32.mrb[13].mxu0 }
 0x4e6   : > { %v855_v23 = vpop.f32.mrb[14].mxu0 }
 0x4e7   : > { %v1527_v25 = vpop.f32.mrb[15].mxu0  ;;  %1531 = vmatmul.mubr.msk.bf16.vlgmr.msra.gmra.mrb[12].mxu1 %vm634_vm2, %v858_v21 }
 0x4e8   : > { %1541 = vmatpush3.bf16.xpose.msra.mxu1 %v959_v24  ;;  %1542 = vmatprep.mubr.msk.bf16.mxu1 %vm1918_vm0, %v1917_v0 }
 0x4e9   : > { %1552 = vmatprep.subr.bf16.mxu1 %v1917_v0 }
 0x4ef   : > { %1543 = vmatmul.mubr.msk.bf16.vlgmr.msra.gmra.mrb[16].mxu1 %vm634_vm2, %v952_v26 }
 0x4f0   : > { %1554 = vmatprep.mubr.msk.bf16.mxu1 %vm1918_vm0, %v1917_v0 }
 0x547   : > { %v945_v28 = vpop.f32.mrb[16].mxu0 }
 0x548   : > { %v1538_v29 = vpop.f32.mrb[17].mxu0 }
 0x549   : > { %v948_v30 = vpop.f32.mrb[18].mxu0 }
 0x54a   : > { %v1539_v31 = vpop.f32.mrb[19].mxu0  ;;  %v1442_v30 = vld [vmem:[%s2437_s23] ss:$0 sm:$0xff] }
 0x5ba   : > { %v899_v32 = vpop.f32.mrb[12].mxu1 }
 0x5bb   : > { %v2319_v33 = vadd.f32 %v945_v28, %v899_v32  ;;  %v1532_v34 = vpop.f32.mrb[13].mxu1 }
 0x5bc   : > { %v902_v35 = vpop.f32.mrb[14].mxu1 }
 0x5bd   : > { %v1533_v36 = vpop.f32.mrb[15].mxu1 }
 0x5c2   : > { %v995_v37 = vpop.f32.mrb[16].mxu1 }
 0x5c3   : > { %v1001_v38 = vmul.f32 0.35355338, %v995_v37  ;;  %v1544_v39 = vpop.f32.mrb[17].mxu1 }
 0x5c4   : > { %v998_v40 = vpop.f32.mrb[18].mxu1 }
 0x5c5   : > { %v1545_v41 = vpop.f32.mrb[19].mxu1  ;;  %v1002_v42 = vadd.f32 %v1001_v38, %v2276_v27 }
 0x5c7   : > { %v1003_v43 = vsel %vm634_vm2, %v1002_v42, -inf }
 0x5c8   : > { %1004 = vmax.xlane.f32.xlu1 %v1003_v43 }
 0x655   : > { %v1005_v44 = vpop.xlane.xlu1 %1004 }
 0x656   : > { %v1006_v45 = vsub.f32 %v1002_v42, %v1005_v44 }
 0x658   : > { %v1007_v46 = vmul.f32 1.442695, %v1006_v45 }
 0x65a   : > { %1684 = vpow2.f32 %v1007_v46 }
 0x664   : > { %v1685_v47 = vpop.eup %1684 }
 0x665   : > { %v1009_v48 = vsel %vm634_vm2, %v1685_v47, 0.0 }
 0x666   : > { %1010 = vadd.xlane.f32.xlu0 %v1009_v48 }
 0x67c   : > { %1113 = vrot.lane.b32.xlu0 %v2242_v13, %s1921_s25 }
 0x680   : > { %1111 = vrot.lane.b32.xlu0 %v2246_v18, %s1921_s25  ;;  %v632_v18 = vld [vmem:[#allocation10 + $0x8] sm:$0xf] }
 0x681   : > { %v1068_v56 = vsel %vm698_vm3, %v632_v18, 0 }
 0x682   : > { %1553 = vmatpush3.bf16.msra.mxu1 %v1068_v56 }
 0x683   : > { %1564 = vmatprep.subr.bf16.mxu1 %v1917_v0 }
 0x6f3   : > { %v1011_v49 = vpop.xlane.xlu0 %1010 }
 0x6f4   : > { %1686 = vrcp.f32 %v1011_v49 }
 0x6f7   : > { %v1114_v53 = vpop.permute.xlu0 %1113 }
 0x6f8   : > { %v1119_v55 = vsel %vm634_vm2, %v1114_v53, 0 }
 0x6fb   : > { %v1112_v13 = vpop.permute.xlu0 %1111 }
 0x6fe   : > { %v1687_v50 = vpop.eup %1686 }
 0x6ff   : > { %v1013_v51 = vmul.f32 %v1687_v50, %v1685_v47 }
 0x701   : > { %v1014_v54 = vpack.c.bf16 %v1013_v51, %v1013_v51 }
 0x703   : > { %1549 = vmatmul.mubr.msk.bf16.vlgmr.msra.gmra.mrb[20].mxu0 %vm634_vm2, %v1014_v54 }
 0x704   : > { %1559 = vmatpush3.bf16.xpose.msra.mxu0 %v1119_v55  ;;  %1560 = vmatprep.mubr.msk.bf16.mxu0 %vm1918_vm0, %v1917_v0 }
 0x705   : > { %1570 = vmatprep.subr.bf16.mxu0 %v1917_v0 }
 0x70b   : > { %1561 = vmatmul.mubr.msk.bf16.vlgmr.msra.gmra.mrb[24].mxu0 %vm634_vm2, %v1112_v13 }
 0x70c   : > { %1572 = vmatprep.mubr.msk.bf16.mxu0 %vm1918_vm0, %v1917_v0 }
 0x7d6   : > { %v1057_v57 = vpop.f32.mrb[20].mxu0 }
 0x7d7   : > { %v1063_v58 = vpack.c.bf16 %v1057_v57, %v1057_v57  ;;  %v1550_v59 = vpop.f32.mrb[21].mxu0 }
 0x7d8   : > { %v1060_v60 = vpop.f32.mrb[22].mxu0 }
 0x7d9   : > { %v1551_v61 = vpop.f32.mrb[23].mxu0  ;;  %1555 = vmatmul.mubr.msk.bf16.vlgmr.msra.gmra.mrb[20].mxu1 %vm634_vm2, %v1063_v58 }
 0x7da   : > { %1566 = vmatprep.mubr.msk.bf16.mxu1 %vm1918_vm0, %v1917_v0  ;;  %v633_v0 = vld [vmem:[#allocation10 + $0xc] sm:$0xf] }
 0x7db   : > { %v1228_v11 = vsel %vm698_vm3, %v633_v0, 0 }
 0x7dc   : > { %1571 = vmatpush3.bf16.msra.mxu0 %v1228_v11 }
 0x7de   : > { %v1155_v62 = vpop.f32.mrb[24].mxu0 }
 0x7df   : > { %v1161_v63 = vmul.f32 0.35355338, %v1155_v62  ;;  %v1562_v1 = vpop.f32.mrb[25].mxu0 }
 0x7e0   : > { %v1158_v2 = vpop.f32.mrb[26].mxu0 }
 0x7e1   : > { %v1563_v3 = vpop.f32.mrb[27].mxu0  ;;  %v1162_v4 = vadd.f32 %v1161_v63, %v2276_v27 }
 0x7e3   : > { %v1163_v5 = vsel %vm634_vm2, %v1162_v4, -inf }
 0x7e4   : > { %1164 = vmax.xlane.f32.xlu0 %v1163_v5 }
 0x871   : > { %v1165_v6 = vpop.xlane.xlu0 %1164 }
 0x872   : > { %v1166_v7 = vsub.f32 %v1162_v4, %v1165_v6 }
 0x874   : > { %v1167_v8 = vmul.f32 1.442695, %v1166_v7 }
 0x876   : > { %1688 = vpow2.f32 %v1167_v8 }
 0x880   : > { %v1689_v9 = vpop.eup %1688 }
 0x881   : > { %v1169_v10 = vsel %vm634_vm2, %v1689_v9, 0.0 }
 0x882   : > { %1170 = vadd.xlane.f32.xlu1 %v1169_v10 }
 0x893   : > { %1175 = vrot.lane.b32.xlu1 %v2283_v52, %s1921_s25  ;;  %s1922_s25 = smov [#allocation11]  }
 0x894   : > { %s1838_s20 = sshll.u32 %s1922_s25, 4  ;;  %s1839_s20 = int_to_ptr.vmem [resolvable:$false] %s1838_s20 }
 0x895   : > { %s1840_s24 = scalar_lea.vmem %s1839_s20, 256  ;;  %p1841_p12 = scmp.lt.s32.totalorder %s2361_s26, %s1839_s20 }
 0x896   : > { %p1842_p3 = scmp.lt.s32.totalorder %s1840_s24, %s1834_s12 }
 0x898   : > { %p1843_p13 = por %p1842_p3, %p1841_p12 }
 0x89a   : > { %p1844_p0 = pnand %p1843_p13, %p1837_p9 }
 0x8ac   : > { %v1104_v12 = vpop.f32.mrb[20].mxu1 }
 0x8ad   : > { %v1110_v27 = vadd.f32 %v1104_v12, %v2319_v33  ;;  %v1556_v14 = vpop.f32.mrb[21].mxu1 }
 0x8ae   : > { %v1107_v15 = vpop.f32.mrb[22].mxu1 }
 0x8af   : > { %v1557_v16 = vpop.f32.mrb[23].mxu1 }
 0x90f   : > { %v1171_v17 = vpop.xlane.xlu1 %1170 }
 0x910   : > { %1690 = vrcp.f32 %v1171_v17 }
 0x913   : > { %v1176_v19 = vpop.permute.xlu1 %1175 }
 0x914   : > { %v1181_v20 = vsel %vm698_vm3, %v1176_v19, 0 }
 0x915   : > { %1565 = vmatpush3.bf16.msra.mxu1 %v1181_v20 }
 0x91a   : > { %v1691_v21 = vpop.eup %1690 }
 0x91b   : > { %v1173_v52 = vmul.f32 %v1691_v21, %v1689_v9 }
 0x91d   : > { %v1174_v22 = vpack.c.bf16 %v1173_v52, %v1173_v52 }
 0x91f   : > { %1567 = vmatmul.mubr.msk.bf16.vlgmr.msra.gmra.mrb[24].mxu1 %vm634_vm2, %v1174_v22 }
 0x9f2   : > { %v1217_v23 = vpop.f32.mrb[24].mxu1 }
 0x9f3   : > { %v1223_v24 = vpack.c.bf16 %v1217_v23, %v1217_v23  ;;  %v1568_v25 = vpop.f32.mrb[25].mxu1 }
 0x9f4   : > { %v1220_v26 = vpop.f32.mrb[26].mxu1 }
 0x9f5   : > { %v1569_v28 = vpop.f32.mrb[27].mxu1  ;;  %1573 = vmatmul.mubr.msk.bf16.vlgmr.msra.gmra.mrb[28].mxu0 %vm634_vm2, %v1223_v24 }
 0xac8   : > { %v1264_v29 = vpop.f32.mrb[28].mxu0 }
 0xac9   : > { %v1270_v31 = vadd.f32 %v1264_v29, %v1110_v27  ;;  %v1574_v32 = vpop.f32.mrb[29].mxu0 }
 0xaca   : > { %v1267_v33 = vpop.f32.mrb[30].mxu0 }
 0xacb   : > { %v1278_v34 = vadd.f32 %v1442_v30, %v1270_v31  ;;  %v1575_v35 = vpop.f32.mrb[31].mxu0 }
 0xacd   : > { %1279 = vst.msk [vmem:[%s430_s29] sm:$0xff] %vm456_vm1, %v1278_v34 }
 0xace   : > { %1847 = shalt.err (!%p1844_p0)
}
 0xacf   : > { %s1848_s1 = scalar_lea.hbm %s2359_s22, 128  ;;  %s1852_s10 = scalar_lea.hbm %s2438_s18, 256 }
 0xad0   : > { %p1849_p2 = scmp.ne.s32.totalorder %s2359_s22, %s1848_s1  ;;  %p1853_p10 = scmp.lt.u32.totalorder %s2359_s22, %s2438_s18 }
 0xad1   : > { %p1854_p11 = scmp.lt.u32.totalorder %s1852_s10, %s1848_s1  ;;  %p1856_p6 = scmp.lt.u32.totalorder %s1848_s1, %s2359_s22 }
 0xad2   : > { %p1850_p8 = pnand %p1849_p2, %p2439_p5 }
 0xad3   : > { %p1855_p1 = por %p1854_p11, %p1853_p10 }
 0xad4   : > { %p1851_p4 = pneg %p1850_p8 }
 0xad5   : > { %p1857_p7 = por %p1856_p6, %p1855_p1 }
 0xad7   : > { %p1858_p9 = pnand %p1857_p7, %p1851_p4 }
 0xad9   : > { %1861 = shalt.err (!%p1858_p9)
}
 0xada   : > { %1594 = dma.vmem_to_hbm [thread:$0]  (%p2439_p5), %s2361_s26, 128, %s2359_s22, %s1281_s19  }
 0xadb PF: > { %s1306_s21 = sand.u32 1, %s1896_s13   ;;  %p2440_p12 = scmp.ne.s32.totalorder %s2430_s17, 0 }
 0xadc   : > { %p2441_p3 = scmp.ge.s32.totalorder %s1908_s16, 2  ;;  %s1307_s12 = scalar_lea.sflag [#allocation4], %s1306_s21 }
 0xade   : > { %p1614_p13 = pnand %p2441_p3, %p2440_p12 }
 0xae0   : > { %1891 = dma.done.wait (!%p1614_p13), %s1307_s12, 128  }
 0xae1   : > { %1893 = vsyncadd (!%p1614_p13), %s1307_s12, 4294967168  ;;  %p25_p0 = scmp.ge.s32.totalorder %s2128_s11, 4   ;;  %s2442_s13 = smov %s1900_s14 }
 0xae2   : > { %s2443_s14 = smov %s1904_s15  ;;  %s2444_s15 = smov %s2139_s30 }
 0xae3   : > { %s2445_s16 = smov %s2128_s11  ;;  %27 = sbr.rel (!%p25_p0) target bundleno = 11 (0xb), region = 121 }
 0xaea   :  { %1312 = vsyncpa [#allocation3], 1 }
 0xaeb   :  { %1314 = vsyncpa [#allocation3 + $0x1], 1 }
 0xaec   :  { %1315 = vsyncpa [#allocation6], 1 }
 0xaed   :  { %1316 = vsyncpa [#allocation9], 1 }
 0xaee   :  { %1317 = vsyncpa [#allocation4], 1 }
 0xaef   :  { %1319 = vsyncpa [#allocation4 + $0x1], 1 }

</bundles_post_ra>
